<compile_context>
chip_gen: v5e
topology: v5e:2x2
jax: 0.10.0
libtpu: 0.0.40
codegen_flags: <defaults>
</compile_context>

<pallas_src>
import jax
import jax.numpy as jnp
from jax import lax
from jax.experimental import pallas as pl
from jax.experimental.pallas import tpu as pltpu


_LANE_CANDIDATES = (512, 1024, 2048, 256, 128)   # prefer 512-wide lane axis


def _tpu_config():
    """Returns (splits, tile_bytes_per_input, vmem_limit_bytes) per generation."""
    kind = ""
    try:
        kind = jax.devices()[0].device_kind.lower()
    except Exception:
        pass
    if "v7" in kind:           # 2 TC/chip, 64 MiB VMEM, ~3.2 TB/s HBM
        return 2, 8 << 20, 48 << 20
    if "v6" in kind:           # 1 TC, 128 MiB VMEM, ~1.4 TB/s HBM
        return 1, 12 << 20, 64 << 20
    if "v5" in kind:           # v5e: 1 TC, low (16 MiB) default scoped-VMEM
        return 1, 4 << 20, 32 << 20
    return 1, 8 << 20, 48 << 20


def _make_sse_kernel(rows, tile_rows, lanes, bps, need_mask):
    """Builds the sum-of-squared-differences kernel (constants closed over)."""

    def kernel(x_ref, t_ref, out_ref):
        i = pl.program_id(1)          # reduction axis over row-tiles

        @pl.when(i == 0)
        def _():
            out_ref[...] = jnp.zeros_like(out_ref)

        d = x_ref[...].astype(jnp.float32) - t_ref[...].astype(jnp.float32)
        dd = d * d

        if need_mask:
            blk = pl.program_id(0) * bps + i
            is_interior = (blk + 1) * tile_rows <= rows

            @pl.when(is_interior)
            def _():
                # Hot path: pure sub/mul/add, no masking cost.
                out_ref[...] += jnp.sum(dd, axis=0, keepdims=True)

            @pl.when(jnp.logical_not(is_interior))
            def _():
                # Ragged last tile / clamped duplicate blocks: zero rows past
                # the real extent (Pallas does not zero out-of-bounds data).
                row_ids = blk * tile_rows + lax.broadcasted_iota(
                    jnp.int32, (tile_rows, lanes), 0)
                out_ref[...] += jnp.sum(
                    jnp.where(row_ids < rows, dd, 0.0), axis=0, keepdims=True)
        else:
            out_ref[...] += jnp.sum(dd, axis=0, keepdims=True)

    return kernel


def content_loss_forward(x, target, *, tile_bytes=None, splits=None,
                         vmem_limit_bytes=None):
    """Pallas implementation of contentLoss.forward.

    Returns (x, loss) with loss = mse(x, target) * W * W * 0.5 (f32 scalar),
    where W = x.shape[-1] (as in the PyTorch module).
    """
    assert x.shape == target.shape, "input / target shape mismatch"
    N = x.shape[-1]                  # PyTorch: N = input.shape[-1]
    n_elems = x.size

    cfg_splits, cfg_tile_bytes, cfg_vmem = _tpu_config()
    splits = cfg_splits if splits is None else splits
    tile_bytes = cfg_tile_bytes if tile_bytes is None else tile_bytes
    vmem_limit_bytes = cfg_vmem if vmem_limit_bytes is None else vmem_limit_bytes

    # ---- lane-dense flattening (reshape of contiguous data: no HBM copy) ----
    lanes = next((l for l in _LANE_CANDIDATES if n_elems % l == 0), None)
    if lanes is None:
        # Pathological total not divisible by 128: minimally pad the flat 1-D
        # view with zeros (zero difference -> zero contribution to the SSE).
        # TODO(synk): this fallback materializes padded copies in HBM.
        lanes = 128
        pad = (-n_elems) % lanes
        xf = jnp.pad(x.reshape(-1), (0, pad))
        tf = jnp.pad(target.reshape(-1), (0, pad))
        slab_elems = n_elems + pad
    else:
        xf = x.reshape(-1)
        tf = target.reshape(-1)
        slab_elems = n_elems

    rows = slab_elems // lanes
    x2 = xf.reshape(rows, lanes)
    t2 = tf.reshape(rows, lanes)

    # ---- dtype-aware tile sizing & sublane alignment ----
    itemsize = jnp.dtype(x.dtype).itemsize
    sub = max(8, 32 // itemsize)                  # 8 f32, 16 bf16, 32 int8/fp8
    tile_elems = max(tile_bytes // itemsize, lanes * sub)
    tile_rows = min(max(tile_elems // lanes, sub), rows)
    if tile_rows < rows:
        tile_rows = max((tile_rows // sub) * sub, sub)   # sublane-aligned

    nblocks = pl.cdiv(rows, tile_rows)            # total row-tiles
    splits = max(1, min(splits, nblocks))         # never duplicate whole tensor
    bps = pl.cdiv(nblocks, splits)                # row-tiles per split
    need_mask = (splits * bps * tile_rows != rows)

    kernel = _make_sse_kernel(rows, tile_rows, lanes, bps, need_mask)

    def in_map(c, i):
        # Clamp so we never DMA a fully out-of-bounds block; duplicated /
        # over-covered rows are masked to zero inside the kernel.
        return (jnp.minimum(c * bps + i, nblocks - 1), 0)

    partials = pl.pallas_call(
        kernel,
        out_shape=jax.ShapeDtypeStruct((1, splits * lanes), jnp.float32),
        grid_spec=pltpu.PrefetchScalarGridSpec(
            num_scalar_prefetch=0,
            grid=(splits, bps),
            in_specs=[
                pl.BlockSpec((tile_rows, lanes), in_map),
                pl.BlockSpec((tile_rows, lanes), in_map),
            ],
            # One lane-dense partial-sum row per split; resident across the
            # reduction axis and accumulated into directly (no scratch).
            out_specs=pl.BlockSpec((1, lanes), lambda c, i: (0, c)),
        ),
        compiler_params=pltpu.CompilerParams(
            dimension_semantics=("parallel", "arbitrary"),
            vmem_limit_bytes=vmem_limit_bytes,
        ),
        cost_estimate=pl.CostEstimate(
            flops=3 * n_elems,
            transcendentals=0,
            bytes_accessed=2 * n_elems * itemsize,
        ),
    )(x2, t2)

    # Final tiny cross-lane reduce + mse scaling (scalar glue) in JAX.
    sse = jnp.sum(partials)
    loss = sse / jnp.float32(n_elems) * jnp.float32(N * N) * jnp.float32(0.5)
    # TODO(synk): the PyTorch module stores the loss as a side effect
    # (self.loss) and returns only `input`; here it is returned explicitly.
    return x, loss


if __name__ == "__main__":
    key = jax.random.PRNGKey(0)
    kx, kt, kx2, kt2 = jax.random.split(key, 4)

    # Small shape matching the module's typical use (feature map B, C, H, W).
    B, C, H, W = 2, 4, 16, 16
    x = jax.random.normal(kx, (B, C, H, W), dtype=jnp.float32)
    target = jax.random.normal(kt, (B, C, H, W), dtype=jnp.float32)

    out, loss = content_loss_forward(x, target)
    jax.block_until_ready(out)
    jax.block_until_ready(loss)

    ref_loss = jnp.mean((x - target) ** 2) * W * W * 0.5
    assert jnp.allclose(loss, ref_loss, rtol=2e-5, atol=1e-4), (loss, ref_loss)
    assert jnp.array_equal(out, x)

    # Second check: small tile override + 2-way split to exercise the
    # multi-tile, ragged-mask, and clamped-duplicate-block paths on any chip.
    B2, C2, H2, W2 = 2, 6, 56, 64
    xb = jax.random.normal(kx2, (B2, C2, H2, W2), dtype=jnp.float32)
    tb = jax.random.normal(kt2, (B2, C2, H2, W2), dtype=jnp.float32)
    out2, loss2 = content_loss_forward(xb, tb, tile_bytes=8 * 512 * 4, splits=2)
    jax.block_until_ready(loss2)
    ref2 = jnp.mean((xb - tb) ** 2) * W2 * W2 * 0.5
    assert jnp.allclose(loss2, ref2, rtol=2e-5, atol=1e-4), (loss2, ref2)
    assert jnp.array_equal(out2, xb)

    print("KERNEL_OK")
</pallas_src>

<mosaic_0001>
module attributes {stable_mosaic.version = 11 : i64} {
  func.func @kernel(%arg0: i32, %arg1: i32, %arg2: memref<4x512xf32, #tpu.memory_space<vmem>>, %arg3: memref<4x512xf32, #tpu.memory_space<vmem>>, %arg4: memref<1x512xf32, #tpu.memory_space<vmem>>) attributes {dimension_semantics = [#tpu.dimension_semantics<parallel>, #tpu.dimension_semantics<arbitrary>], iteration_bounds = array<i64: 1, 1>, scalar_prefetch = 0 : i64, scratch_operands = 0 : i64, tpu.core_type = #tpu.core_type<tc>, window_params = [{transform_indices = @transform_0, window_bounds = array<i64: 4, 512>}, {transform_indices = @transform_1, window_bounds = array<i64: 4, 512>}, {transform_indices = @transform_2, window_bounds = array<i64: 1, 512>}]} {
    %c0_i32 = arith.constant 0 : i32
    %0 = arith.cmpi eq, %arg1, %c0_i32 : i32
    %1 = arith.extui %0 : i1 to i32
    %c0_i32_0 = arith.constant 0 : i32
    %2 = arith.cmpi ne, %1, %c0_i32_0 : i32
    scf.if %2 {
      %cst_8 = arith.constant 0.000000e+00 : f32
      %12 = vector.broadcast %cst_8 : f32 to vector<1x512xf32>
      %c0_9 = arith.constant 0 : index
      %c0_10 = arith.constant 0 : index
      %13 = vector.load %arg4[%c0_9, %c0_10] : memref<1x512xf32, #tpu.memory_space<vmem>>, vector<1x512xf32>
      tpu.vector_store %arg4[%c0_9, %c0_10], %12 {strides = array<i32>} : memref<1x512xf32, #tpu.memory_space<vmem>>, vector<1x512xf32>,
    } else {
    }
    %c0 = arith.constant 0 : index
    %c0_1 = arith.constant 0 : index
    %3 = vector.load %arg2[%c0, %c0_1] : memref<4x512xf32, #tpu.memory_space<vmem>>, vector<4x512xf32>
    %c0_2 = arith.constant 0 : index
    %c0_3 = arith.constant 0 : index
    %4 = vector.load %arg3[%c0_2, %c0_3] : memref<4x512xf32, #tpu.memory_space<vmem>>, vector<4x512xf32>
    %5 = arith.subf %3, %4 : vector<4x512xf32>
    %6 = arith.mulf %5, %5 : vector<4x512xf32>
    %c0_4 = arith.constant 0 : index
    %c0_5 = arith.constant 0 : index
    %7 = vector.load %arg4[%c0_4, %c0_5] : memref<1x512xf32, #tpu.memory_space<vmem>>, vector<1x512xf32>
    %cst = arith.constant dense<0.000000e+00> : vector<512xf32>
    %8 = vector.multi_reduction <add>, %6, %cst [0] : vector<4x512xf32> to vector<512xf32>
    %9 = vector.shape_cast %8 : vector<512xf32> to vector<1x512xf32>
    %10 = arith.addf %7, %9 : vector<1x512xf32>
    %c0_6 = arith.constant 0 : index
    %c0_7 = arith.constant 0 : index
    %11 = vector.load %arg4[%c0_6, %c0_7] : memref<1x512xf32, #tpu.memory_space<vmem>>, vector<1x512xf32>
    tpu.vector_store %arg4[%c0_6, %c0_7], %10 {strides = array<i32>} : memref<1x512xf32, #tpu.memory_space<vmem>>, vector<1x512xf32>,
    return
  }
  func.func @transform_0(%arg0: i32, %arg1: i32) -> (i32, i32) {
    %c1_i32 = arith.constant 1 : i32
    %0 = arith.muli %arg0, %c1_i32 : i32
    %1 = arith.addi %0, %arg1 : i32
    %c0_i32 = arith.constant 0 : i32
    %2 = arith.minsi %1, %c0_i32 : i32
    %c0_i32_0 = arith.constant 0 : i32
    %c0_i32_1 = arith.constant 0 : i32
    return %2, %c0_i32_0 : i32, i32
  }
  func.func @transform_1(%arg0: i32, %arg1: i32) -> (i32, i32) {
    %c1_i32 = arith.constant 1 : i32
    %0 = arith.muli %arg0, %c1_i32 : i32
    %1 = arith.addi %0, %arg1 : i32
    %c0_i32 = arith.constant 0 : i32
    %2 = arith.minsi %1, %c0_i32 : i32
    %c0_i32_0 = arith.constant 0 : i32
    %c0_i32_1 = arith.constant 0 : i32
    return %2, %c0_i32_0 : i32, i32
  }
  func.func @transform_2(%arg0: i32, %arg1: i32) -> (i32, i32) {
    %c0_i32 = arith.constant 0 : i32
    %c0_i32_0 = arith.constant 0 : i32
    return %c0_i32, %arg0 : i32, i32
  }
}

</mosaic_0001>

<bundles_post_ra>
// kernel: tpu_custom_call.1
= control target key start
LH: loop header
LB: loop body
LE: loop exit
PB: predicated region body
PF: predicated region fallthrough
CT: control target
= control target key end

     0   :  { %7 = vsyncpa [#allocation3], 0  ;;  %s278_s0 = inlined_call_operand.hbm [shape: f32[4,512], index: 0, kind: input, shape index: {}]   ;;  %s279_s1 = inlined_call_operand.hbm [shape: f32[4,512], index: 1, kind: input, shape index: {}]   ;;  %s280_s2 = inlined_call_operand.hbm [shape: f32[1,512], index: 2, kind: output, shape index: {}]  }
   0x1   :  { %8 = vsyncpa [#allocation6], 0 }
   0x2   :  { %9 = vsyncpa [#allocation4], 0  ;;  %s21_s11 = sshll.u32 %s278_s0, 4  ;;  %s242_s12 = smov [#allocation2]   ;;  %s22_s11 = int_to_ptr.hbm [resolvable:$true] %s21_s11 }
   0x3   :  { %s23_s13 = sshll.u32 %s242_s12, 4  ;;  %s38_s16 = sshll.u32 %s279_s1, 4  ;;  %s24_s13 = int_to_ptr.vmem [resolvable:$true] %s23_s13  ;;  %s39_s16 = int_to_ptr.hbm [resolvable:$true] %s38_s16 }
   0x4   :  { %26 = dma.hbm_to_vmem [thread:$0]  %s22_s11, 256, %s24_s13, [#allocation3]  }
   0x5   :  { %s243_s17 = smov [#allocation5]  }
   0x6   :  { %s40_s18 = sshll.u32 %s243_s17, 4  ;;  %s41_s18 = int_to_ptr.vmem [resolvable:$true] %s40_s18 }
   0x7   :  { %43 = dma.hbm_to_vmem [thread:$0]  %s39_s16, 256, %s41_s18, [#allocation6]  }
   0x8   :  { %236 = dma.done.wait [#allocation3], 256  }
   0x9   :  { %237 = vsyncadd [#allocation3], 4294967040 }
   0xa   :  { %238 = dma.done.wait [#allocation6], 256  }
   0xb   :  { %239 = vsyncadd [#allocation6], 4294967040  ;;  %v62_v0 = vlaneseq  ;;  %v244_v2 = vmov 0.0   ;;  %v67_v3 = vld [vmem:[#allocation2] sm:$0xff]  ;;  %v69_v4 = vld [vmem:[#allocation5] sm:$0xff]  ;;  %vm89_vm1 = vcmask 1043456  }
   0xc   :  { %v68_v5 = vld [vmem:[#allocation2 + $0x8] sm:$0xff]  ;;  %v71_v6 = vsub.f32 %v67_v3, %v69_v4  ;;  %v70_v7 = vld [vmem:[#allocation5 + $0x8] sm:$0xff]  ;;  %vm125_vm2 = vcmask 1040384   ;;  %vm127_vm3 = vcmask 1042434   ;;  %vm129_vm4 = vcmask 1041408   ;;  %s245_s0 = smov [#allocation7]  }
   0xd   :  { %vm267_vm0 = vcmp.lt.s32.totalorder %v62_v0, 512  ;;  %v72_v8 = vsub.f32 %v68_v5, %v70_v7  ;;  %s143_s1 = sshll.u32 %s245_s0, 4  ;;  %s145_s21 = sshll.u32 %s280_s2, 4  ;;  %s144_s1 = int_to_ptr.vmem [resolvable:$true] %s143_s1  ;;  %s146_s21 = int_to_ptr.hbm [resolvable:$true] %s145_s21 }
   0xe   :  { %66 = vst.msk [vmem:[#allocation7] sm:$0xf] %vm267_vm0, %v244_v2  ;;  %v73_v9 = vmul.f32 %v71_v6, %v71_v6 }
   0xf   :  { %v74_v10 = vmul.f32 %v72_v8, %v72_v8 }
  0x10   :  { %78 = vst [vmem:[#allocation1] ss:$2 sm:$0xff] %v73_v9 }
  0x11   :  { %80 = vst [vmem:[#allocation1 + $0x10] ss:$2 sm:$0xff] %v74_v10 }
  0x15   :  { %v75_v46 = vld [vmem:[#allocation7] sm:$0xf] }
  0x17   :  { %v81_v11 = vld.sshfl [vmem:[#allocation1] sm:$0xff pattern:$0x75316420]  ;;  %v82_v12 = vld.sshfl [vmem:[#allocation1 + $0x8] sm:$0xff pattern:$0x75316420] }
  0x18   :  { %v83_v13 = vld.sshfl [vmem:[#allocation1 + $0x10] sm:$0xff pattern:$0x75316420]  ;;  %v84_v14 = vld.sshfl [vmem:[#allocation1 + $0x18] sm:$0xff pattern:$0x75316420] }
  0x19   :  { %v90_v15 = vsel %vm89_vm1, %v81_v11, 0.0  ;;  %v97_v16 = vsel %vm89_vm1, %v82_v12, 0.0  ;;  %v104_v17 = vsel %vm89_vm1, %v83_v13, 0.0  ;;  %v111_v18 = vsel %vm89_vm1, %v84_v14, 0.0 }
  0x1a   :  { %v91_v19 = vrot.slane %v90_v15, 4  ;;  %v98_v20 = vrot.slane %v97_v16, 4  ;;  %v105_v21 = vrot.slane %v104_v17, 4  ;;  %v112_v22 = vrot.slane %v111_v18, 4 }
  0x1c   :  { %v92_v23 = vadd.f32 %v91_v19, %v90_v15  ;;  %v99_v24 = vadd.f32 %v98_v20, %v97_v16  ;;  %v106_v25 = vadd.f32 %v105_v21, %v104_v17  ;;  %v113_v26 = vadd.f32 %v112_v22, %v111_v18 }
  0x1e   :  { %v93_v27 = vrot.slane %v92_v23, 2  ;;  %v100_v28 = vrot.slane %v99_v24, 2  ;;  %v107_v29 = vrot.slane %v106_v25, 2  ;;  %v114_v30 = vrot.slane %v113_v26, 2 }
  0x20   :  { %v94_v31 = vadd.f32 %v93_v27, %v92_v23  ;;  %v101_v32 = vadd.f32 %v100_v28, %v99_v24  ;;  %v108_v33 = vadd.f32 %v107_v29, %v106_v25  ;;  %v115_v34 = vadd.f32 %v114_v30, %v113_v26 }
  0x22   :  { %v95_v35 = vrot.slane %v94_v31, 1  ;;  %v102_v36 = vrot.slane %v101_v32, 1  ;;  %v109_v37 = vrot.slane %v108_v33, 1  ;;  %v116_v38 = vrot.slane %v115_v34, 1 }
  0x24   :  { %v103_v39 = vadd.f32 %v102_v36, %v101_v32  ;;  %v110_v40 = vadd.f32 %v109_v37, %v108_v33  ;;  %v117_v41 = vadd.f32 %v116_v38, %v115_v34  ;;  %v96_v42 = vadd.f32 %v95_v35, %v94_v31 }
  0x26   :  { %v122_v43 = vrot.slane %v103_v39, 7  ;;  %v123_v44 = vrot.slane %v110_v40, 6  ;;  %v124_v45 = vrot.slane %v117_v41, 5 }
  0x28   :  { %v126_v47 = vsel %vm125_vm2, %v96_v42, %v122_v43  ;;  %v128_v48 = vsel %vm127_vm3, %v123_v44, %v124_v45 }
  0x29   :  { %v130_v49 = vsel %vm129_vm4, %v126_v47, %v128_v48 }
  0x2a   :  { %v132_v50 = vadd.f32 %v130_v49, %v75_v46 }
  0x2c   :  { %137 = vst.msk [vmem:[#allocation7] sm:$0xf] %vm267_vm0, %v132_v50 }
  0x2d   :  { %148 = dma.vmem_to_hbm [thread:$0]  %s144_s1, 64, %s146_s21, [#allocation4]  }
  0x2e   :  { %240 = dma.done.wait [#allocation4], 64  }
  0x2f   :  { %241 = vsyncadd [#allocation4], 4294967232 }
  0x30   :  { %153 = vsyncpa [#allocation3], 1 }
  0x31   :  { %154 = vsyncpa [#allocation6], 1 }
  0x32   :  { %155 = vsyncpa [#allocation4], 1 }

</bundles_post_ra>
